<compile_context>
chip_gen: v5e
topology: v5e:2x2
jax: 0.10.0
libtpu: 0.0.40
codegen_flags: <defaults>
</compile_context>

<pallas_src>
import numpy as np
import jax
import jax.numpy as jnp
from jax.experimental import pallas as pl
from jax.experimental.pallas import tpu as pltpu


_LANE = 128
_SUBLANE = 8
_SMALL_OUTPUT_BYTES = 64 * 1024          # below this, let XLA fuse the concat
_VMEM_HEADROOM = 2 * 1024 * 1024


def _vmem_capacity_bytes():
    """Best-effort per-core VMEM capacity query; conservative fallback (v7x)."""
    try:
        info = pltpu.get_tpu_info()
        cap = getattr(info, "vmem_capacity_bytes", None)
        if cap:
            return int(cap)
    except Exception:
        pass
    return 64 * 1024 * 1024


def _budgets():
    """(double-buffered residency target, vmem_limit cap) per generation."""
    cap = _vmem_capacity_bytes()
    if cap >= 128 * 1024 * 1024:          # v5e / v6e: 128 MiB physical VMEM
        return 48 * 1024 * 1024, 64 * 1024 * 1024
    # v7x (64 MiB physical, 32 MiB scoped default) or unknown
    return 24 * 1024 * 1024, 32 * 1024 * 1024


def _sublane_multiple(dtype_bytes):
    # Packed tile height: f32 -> 8, bf16 -> 16, int8/fp8 -> 32.
    return max(_SUBLANE, 32 // max(dtype_bytes, 1))


def _make_concat_kernel(dims, use_slices):
    """Kernel writing each input tile into the output tile."""
    offsets = np.concatenate([[0], np.cumsum(dims)[:-1]]).astype(int).tolist()

    if use_slices:
        # Every column slice starts/ends on a 128-lane boundary -> unmasked,
        # lane-dense stores, no cross-lane shuffles.
        def kernel(*refs):
            in_refs, out_ref = refs[:-1], refs[-1]
            for ref, off, d in zip(in_refs, offsets, dims):
                out_ref[:, off:off + d] = ref[...]
    else:
        # Narrow / unaligned inputs: assemble the full row in vregs and issue a
        # single full-width store instead of many masked vst.msk.
        def kernel(*refs):
            in_refs, out_ref = refs[:-1], refs[-1]
            out_ref[...] = jnp.concatenate([r[...] for r in in_refs], axis=-1)

    return kernel


def _choose_batch_tile(batch, total_cols, dtype_bytes, sub, residency_budget):
    """Pick the batch tile: as big as the VMEM budget allows, but always split
    into >= 2 (small batch) / >= 4 (normal batch) grid steps for DMA overlap
    and v7x dual-TC sharding."""
    per_row = 4 * total_cols * dtype_bytes        # 2x-buffered in + 2x-buffered out
    tb_budget = max(residency_budget // per_row, sub)

    if batch >= 4 * sub:
        tb_steps = -(-batch // 4)                 # aim for >= 4 grid steps
    elif batch >= 2 * sub:
        tb_steps = -(-batch // 2)                 # at least 2 steps
    else:
        return batch                              # too small to split legally

    tb = min(tb_budget, tb_steps)
    tb = max(sub, (tb // sub) * sub)              # dtype-aligned sublane multiple
    return min(tb, batch)


def _concat_2d(xs, residency_budget, vmem_limit_cap):
    batch = xs[0].shape[0]
    dtype = xs[0].dtype
    dims = [int(x.shape[1]) for x in xs]
    total = int(sum(dims))
    dtype_bytes = jnp.dtype(dtype).itemsize
    sub = _sublane_multiple(dtype_bytes)

    tb = _choose_batch_tile(batch, total, dtype_bytes, sub, residency_budget)
    grid = (pl.cdiv(batch, tb),)

    lane_aligned = all(d % _LANE == 0 for d in dims)
    # Many narrow-but-aligned inputs fragment the (single, on v5e) vst slot;
    # coalesce those too.
    use_slices = lane_aligned and not (len(dims) > 4 and min(dims) < 2 * _LANE)
    kernel = _make_concat_kernel(dims, use_slices)

    # Exact double-buffered residency + fixed headroom (no double counting).
    residency = 4 * total * tb * dtype_bytes
    vmem_limit = int(min(vmem_limit_cap,
                         max(residency + _VMEM_HEADROOM, 8 * 1024 * 1024)))

    return pl.pallas_call(
        kernel,
        out_shape=jax.ShapeDtypeStruct((batch, total), dtype),
        grid=grid,
        in_specs=[pl.BlockSpec((tb, d), lambda i: (i, 0)) for d in dims],
        out_specs=pl.BlockSpec((tb, total), lambda i: (i, 0)),
        compiler_params=pltpu.CompilerParams(
            dimension_semantics=("parallel",),    # batch tiles are independent
            vmem_limit_bytes=vmem_limit,
        ),
    )(*xs)


def concat_last_axis(xs):
    """Pallas equivalent of RealConCatModule.forward: torch.cat(xs, dim=-1)."""
    assert len(xs) >= 1
    lead = xs[0].shape[:-1]
    dtype = xs[0].dtype
    for x in xs:
        assert x.shape[:-1] == lead and x.dtype == dtype
    if len(xs) == 1:
        return xs[0]

    dims = [int(x.shape[-1]) for x in xs]
    total = int(sum(dims))
    batch = int(np.prod(lead)) if len(lead) > 0 else 1
    dtype_bytes = jnp.dtype(dtype).itemsize
    sub = _sublane_multiple(dtype_bytes)

    residency_budget, vmem_limit_cap = _budgets()
    out_bytes = batch * total * dtype_bytes
    min_residency = 4 * total * sub * dtype_bytes   # smallest legal tile

    # Fast path: tiny outputs / sub-128-lane rows are strictly faster via
    # XLA's fused concat; ultra-wide rows whose minimal tile exceeds the VMEM
    # budget also bail out (a column-tiling Pallas path would be needed).
    if (total < _LANE
            or out_bytes < _SMALL_OUTPUT_BYTES
            or min_residency > residency_budget):
        return jnp.concatenate(xs, axis=-1)

    xs2d = [x.reshape(batch, d) for x, d in zip(xs, dims)]
    out2d = _concat_2d(xs2d, residency_budget, vmem_limit_cap)
    return out2d.reshape(*lead, total)


if __name__ == "__main__":
    key = jax.random.PRNGKey(0)
    k1, k2, k3, k4, k5, k6, k7, k8 = jax.random.split(key, 8)

    # Case 1: typical tiny image/text feature concat -> wrapper fast path
    # (sub-128-lane rows are left to XLA, avoiding a guaranteed regression).
    batch, hidden = 2, 32
    img_feat = jax.random.normal(k1, (batch, hidden), dtype=jnp.float32)
    txt_feat = jax.random.normal(k2, (batch, hidden), dtype=jnp.float32)
    out = jax.block_until_ready(concat_last_axis([img_feat, txt_feat]))
    ref = jnp.concatenate([img_feat, txt_feat], axis=-1)
    assert out.shape == (batch, 2 * hidden), out.shape
    np.testing.assert_allclose(np.asarray(out), np.asarray(ref), rtol=0, atol=0)

    # Case 2: lane-aligned (multiple-of-128) feature dims at a batch large
    # enough to hit the Pallas per-slice store path with >= 4 grid steps.
    a = jax.random.normal(k3, (256, 128), dtype=jnp.float32)
    b = jax.random.normal(k4, (256, 256), dtype=jnp.float32)
    out2 = jax.block_until_ready(concat_last_axis([a, b]))
    ref2 = jnp.concatenate([a, b], axis=-1)
    assert out2.shape == (256, 384), out2.shape
    np.testing.assert_allclose(np.asarray(out2), np.asarray(ref2), rtol=0, atol=0)

    # Case 3: unaligned widths -> Pallas coalesced single full-width store.
    c = jax.random.normal(k5, (512, 96), dtype=jnp.float32)
    d = jax.random.normal(k6, (512, 160), dtype=jnp.float32)
    out3 = jax.block_until_ready(concat_last_axis([c, d]))
    ref3 = jnp.concatenate([c, d], axis=-1)
    assert out3.shape == (512, 256), out3.shape
    np.testing.assert_allclose(np.asarray(out3), np.asarray(ref3), rtol=0, atol=0)

    # Case 4: bf16 3-D inputs (exercises dtype-specific sublane rounding and
    # leading-dim flattening).
    e = jax.random.normal(k7, (4, 32, 128), dtype=jnp.bfloat16)
    f = jax.random.normal(k8, (4, 32, 256), dtype=jnp.bfloat16)
    out4 = jax.block_until_ready(concat_last_axis([e, f]))
    ref4 = jnp.concatenate([e, f], axis=-1)
    assert out4.shape == (4, 32, 384), out4.shape
    np.testing.assert_allclose(np.asarray(out4), np.asarray(ref4), rtol=0, atol=0)

    print("KERNEL_OK")
</pallas_src>

<mosaic_0001>
module attributes {stable_mosaic.version = 11 : i64} {
  func.func @kernel(%arg0: i32, %arg1: memref<64x128xf32, #tpu.memory_space<vmem>>, %arg2: memref<64x256xf32, #tpu.memory_space<vmem>>, %arg3: memref<64x384xf32, #tpu.memory_space<vmem>>) attributes {dimension_semantics = [#tpu.dimension_semantics<parallel>], iteration_bounds = array<i64: 4>, scalar_prefetch = 0 : i64, scratch_operands = 0 : i64, tpu.core_type = #tpu.core_type<tc>, window_params = [{transform_indices = @transform_0, window_bounds = array<i64: 64, 128>}, {transform_indices = @transform_1, window_bounds = array<i64: 64, 256>}, {transform_indices = @transform_2, window_bounds = array<i64: 64, 384>}]} {
    %c0 = arith.constant 0 : index
    %c0_0 = arith.constant 0 : index
    %0 = vector.load %arg1[%c0, %c0_0] : memref<64x128xf32, #tpu.memory_space<vmem>>, vector<64x128xf32>
    %c0_1 = arith.constant 0 : index
    %c0_2 = arith.constant 0 : index
    %1 = vector.load %arg3[%c0_1, %c0_2] : memref<64x384xf32, #tpu.memory_space<vmem>>, vector<64x128xf32>
    tpu.vector_store %arg3[%c0_1, %c0_2], %0 {strides = array<i32>} : memref<64x384xf32, #tpu.memory_space<vmem>>, vector<64x128xf32>,
    %c0_3 = arith.constant 0 : index
    %c0_4 = arith.constant 0 : index
    %2 = vector.load %arg2[%c0_3, %c0_4] : memref<64x256xf32, #tpu.memory_space<vmem>>, vector<64x256xf32>
    %c0_5 = arith.constant 0 : index
    %c128 = arith.constant 128 : index
    %3 = vector.load %arg3[%c0_5, %c128] : memref<64x384xf32, #tpu.memory_space<vmem>>, vector<64x256xf32>
    tpu.vector_store %arg3[%c0_5, %c128], %2 {strides = array<i32>} : memref<64x384xf32, #tpu.memory_space<vmem>>, vector<64x256xf32>,
    return
  }
  func.func @transform_0(%arg0: i32) -> (i32, i32) {
    %c0_i32 = arith.constant 0 : i32
    %c0_i32_0 = arith.constant 0 : i32
    return %arg0, %c0_i32 : i32, i32
  }
  func.func @transform_1(%arg0: i32) -> (i32, i32) {
    %c0_i32 = arith.constant 0 : i32
    %c0_i32_0 = arith.constant 0 : i32
    return %arg0, %c0_i32 : i32, i32
  }
  func.func @transform_2(%arg0: i32) -> (i32, i32) {
    %c0_i32 = arith.constant 0 : i32
    %c0_i32_0 = arith.constant 0 : i32
    return %arg0, %c0_i32 : i32, i32
  }
}

</mosaic_0001>

<bundles_post_ra>
// kernel: tpu_custom_call.1
= control target key start
LH: loop header
LB: loop body
LE: loop exit
PB: predicated region body
PF: predicated region fallthrough
CT: control target
= control target key end

     0   :  { %7 = vsyncpa [#allocation3], 0  ;;  %s811_s0 = inlined_call_operand.hbm [shape: f32[256,128], index: 0, kind: input, shape index: {}]   ;;  %s812_s1 = inlined_call_operand.hbm [shape: f32[256,256], index: 1, kind: input, shape index: {}]   ;;  %s813_s2 = inlined_call_operand.hbm [shape: f32[256,384], index: 2, kind: output, shape index: {}]  }
   0x1   :  { %9 = vsyncpa [#allocation3 + $0x1], 0 }
   0x2   :  { %10 = vsyncpa [#allocation6], 0 }
   0x3   :  { %12 = vsyncpa [#allocation6 + $0x1], 0 }
   0x4   :  { %13 = vsyncpa [#allocation4], 0 }
   0x5   :  { %15 = vsyncpa [#allocation4 + $0x1], 0  ;;  %s604_s9 = smov 0   ;;  %s606_s10 = smov 0  }
   0x6   :  { %s608_s11 = smov 0   ;;  %s610_s12 = smov 0  }
   0x7 LB: > { %s625_s13 = sadd.s32 4294967295, %s581_s12   ;;  %s371_s14 = sadd.s32 4294967294, %s581_s12   ;;  %s581_s12 = sphi %s610_s12, %s823_s12   ;;  %s577_s11 = sphi %s608_s11, %s822_s11   ;;  %s573_s10 = sphi %s606_s10, %s821_s10   ;;  %s569_s9 = sphi %s604_s9, %s820_s9  }
   0x8   : > { %s629_s15 = sadd.s32 1, %s581_s12   ;;  %s28_s16 = sadd.s32 1, %s577_s11 }
   0x9   : > { %s25_s17 = ssub.s32 %s581_s12, %s629_s15  ;;  %p35_p0 = scmp.ne.s32.totalorder %s577_s11, %s573_s10 }
   0xa   : > { %p26_p1 = scmp.eq.s32.totalorder %s25_s17, 0  ;;  %p36_p2 = scmp.eq.s32.totalorder %s581_s12, 0 }
   0xb   : > { %p41_p3 = scmp.ne.s32.totalorder %s573_s10, %s569_s9  ;;  %p42_p4 = scmp.eq.s32.totalorder %s625_s13, 0 }
   0xc   : > { %s641_s18 = scalar_select %p26_p1, %s577_s11, %s28_s16  }
   0xd   : > { %p643_p5 = por %p36_p2, %p35_p0  ;;  %p647_p6 = por %p42_p4, %p41_p3 }
   0xe   : > { %p91_p7 = scmp.eq.s32.totalorder %s625_s13, 3  ;;  %p97_p8 = scmp.eq.s32.totalorder %s371_s14, 3 }
   0xf   : > { %p411_p9 = scmp.lt.s32.totalorder %s581_s12, 4  ;;  %s662_s23 = sand.u32 1, %s577_s11  }
  0x10   : > { %p653_p10 = por %p91_p7, %p35_p0  ;;  %p657_p11 = por %p97_p8, %p41_p3 }
  0x11   : > { %s389_s24 = sshll.u32 %s581_s12, 6  ;;  %s374_s25 = sshll.u32 %s662_s23, 6 }
  0x12   : > { %s126_s28 = scalar_lea.hbm %s811_s0, %s389_s24  ;;  %s121_s30 = scalar_lea.vmem [#allocation2], %s374_s25 }
  0x13   : > { %s127_s29 = sshll.u32 %s126_s28, 4  ;;  %s129_s3 = sshll.u32 %s121_s30, 4  ;;  %s128_s29 = int_to_ptr.hbm [resolvable:$true] %s127_s29  ;;  %s130_s3 = int_to_ptr.vmem [resolvable:$true] %s129_s3 }
  0x14   : > { %p671_p12 = pnand %p411_p9, %p643_p5  ;;  %p381_p13 = scmp.ge.s32.totalorder %s581_s12, 1 }
  0x15   : > { %p160_p0 = scmp.lt.s32.totalorder %s581_s12, 5  ;;  %s118_s5 = scalar_lea.sflag [#allocation3], %s662_s23 }
  0x16   : > { %s451_s6 = sshra.s32 %s128_s29, 4  ;;  %p455_p2 = pneg %p671_p12  ;;  %s452_s6 = int_to_ptr.hbm [resolvable:$true] %s451_s6 }
  0x17   : > { %s453_s7 = scalar_lea.hbm %s452_s6, 64  ;;  %s458_s16 = scalar_lea.hbm %s811_s0, 256 }
  0x18   : > { %p454_p1 = scmp.ne.s32.totalorder %s452_s6, %s453_s7  ;;  %p459_p5 = scmp.lt.s32.totalorder %s452_s6, %s811_s0 }
  0x19   : > { %p460_p7 = scmp.lt.s32.totalorder %s458_s16, %s453_s7 }
  0x1a   : > { %p456_p3 = pnand %p455_p2, %p454_p1 }
  0x1b   : > { %p461_p8 = por %p460_p7, %p459_p5 }
  0x1c   : > { %p457_p4 = pneg %p456_p3 }
  0x1e   : > { %p462_p9 = pnand %p461_p8, %p457_p4 }
  0x20   : > { %465 = shalt.err (!%p462_p9)
}
  0x21   : > { %s583_s24 = smov 128   ;;  %s584_s25 = smov 8  }
  0x22   : > { %403 = dma.hbm_to_vmem [thread:$0]  (!%p671_p12), %s128_s29, 1024, %s130_s3, %s118_s5, %s583_s24, %s583_s24, %s584_s25  }
  0x23   : > { %p695_p1 = pnand %p381_p13, %p160_p0  ;;  %s377_s27 = sshll.u32 %s662_s23, 7 }
  0x24   : > { %s391_s28 = sshll.u32 %s581_s12, 7  ;;  %s143_s14 = scalar_lea.vmem [#allocation5], %s377_s27 }
  0x25   : > { %s149_s7 = scalar_lea.hbm %s812_s1, %s391_s28  ;;  %s152_s16 = sshll.u32 %s143_s14, 4  ;;  %s153_s16 = int_to_ptr.vmem [resolvable:$true] %s152_s16 }
  0x26   : > { %s150_s8 = sshll.u32 %s149_s7, 4  ;;  %s140_s17 = scalar_lea.sflag [#allocation6], %s662_s23  ;;  %s151_s8 = int_to_ptr.hbm [resolvable:$true] %s150_s8 }
  0x27   : > { %s481_s19 = sshra.s32 %s151_s8, 4  ;;  %s488_s24 = scalar_lea.hbm %s812_s1, 512  ;;  %s482_s19 = int_to_ptr.hbm [resolvable:$true] %s481_s19 }
  0x28   : > { %s483_s29 = scalar_lea.hbm %s482_s19, 128  ;;  %p489_p4 = scmp.lt.s32.totalorder %s482_s19, %s812_s1 }
  0x29   : > { %p484_p3 = scmp.ne.s32.totalorder %s482_s19, %s483_s29  ;;  %p490_p5 = scmp.lt.s32.totalorder %s488_s24, %s483_s29 }
  0x2b   : > { %p486_p13 = pnand %p484_p3, %p455_p2  ;;  %p491_p7 = por %p490_p5, %p489_p4 }
  0x2d   : > { %p487_p0 = pneg %p486_p13 }
  0x2f   : > { %p492_p8 = pnand %p491_p7, %p487_p0 }
  0x31   : > { %495 = shalt.err (!%p492_p8)
}
  0x32   : > { %s585_s23 = smov 256   ;;  %s586_s27 = smov 16  }
  0x33   : > { %406 = dma.hbm_to_vmem [thread:$0]  (!%p671_p12), %s151_s8, 2048, %s153_s16, %s140_s17, %s585_s23, %s585_s23, %s586_s27  }
  0x34   : > { %164 = sbr.rel (%p695_p1) target bundleno = 91 (0x5b), region = 28  ;;  %s719_s30 = sand.u32 (!%p695_p1), 1, %s573_s10  }
  0x35   : > { %s382_s6 = sshll.u32 (!%p695_p1), %s719_s30, 6  ;;  %s167_s7 = scalar_lea.sflag (!%p695_p1), [#allocation3], %s719_s30 }
  0x36   : > { %s170_s14 = scalar_lea.vmem (!%p695_p1), [#allocation2], %s382_s6 }
  0x39   : > { %556 = dma.done.wait (%p647_p6), %s167_s7, 1024  }
  0x3a   : > { %558 = vsyncadd (%p647_p6), %s167_s7, 4294966272  ;;  %s383_s4 = sshll.u32 %s719_s30, 7  ;;  %s177_s26 = scalar_lea.sflag [#allocation6], %s719_s30 }
  0x3b   : > { %s729_s8 = scalar_lea.vmem [#allocation5], %s383_s4 }
  0x3c   : > { %560 = dma.done.wait (%p647_p6), %s177_s26, 2048  }
  0x3d   : > { %562 = vsyncadd (%p647_p6), %s177_s26, 4294965248  ;;  %s392_s16 = smul.u32 192, %s719_s30  ;;  %v210_v0 = vld [vmem:[%s170_s14] sm:$0xff]  ;;  %v211_v1 = vld [vmem:[%s170_s14 + $0x8] sm:$0xff]  ;;  %s259_s24 = scalar_lea.sflag [#allocation4], %s719_s30 }
  0x3e   : > { %v212_v2 = vld [vmem:[%s170_s14 + $0x10] sm:$0xff]  ;;  %v213_v3 = vld [vmem:[%s170_s14 + $0x18] sm:$0xff]  ;;  %v214_v4 = vld [vmem:[%s170_s14 + $0x20] sm:$0xff]  ;;  %s393_s20 = smul.u32 192, %s625_s13  ;;  %s531_s6 = scalar_lea.hbm %s813_s2, 768 }
  0x3f   : > { %s736_s17 = scalar_lea.vmem [#allocation7], %s392_s16  ;;  %v215_v5 = vld [vmem:[%s170_s14 + $0x28] sm:$0xff]  ;;  %v216_v6 = vld [vmem:[%s170_s14 + $0x30] sm:$0xff]  ;;  %v217_v7 = vld [vmem:[%s170_s14 + $0x38] sm:$0xff] }
  0x40   : > { %218 = vst [vmem:[%s736_s17] sm:$0xff] %v210_v0  ;;  %v226_v8 = vld [vmem:[%s729_s8] sm:$0xff]  ;;  %v227_v9 = vld [vmem:[%s729_s8 + $0x8] sm:$0xff]  ;;  %v228_v10 = vld [vmem:[%s729_s8 + $0x10] sm:$0xff]  ;;  %s271_s3 = scalar_lea.hbm %s813_s2, %s393_s20  ;;  %s272_s13 = sshll.u32 %s736_s17, 4  ;;  %s273_s13 = int_to_ptr.vmem [resolvable:$true] %s272_s13 }
  0x41   : > { %219 = vst [vmem:[%s736_s17 + $0x18] sm:$0xff] %v211_v1  ;;  %v229_v11 = vld [vmem:[%s729_s8 + $0x18] sm:$0xff]  ;;  %v230_v12 = vld [vmem:[%s729_s8 + $0x20] sm:$0xff]  ;;  %v231_v13 = vld [vmem:[%s729_s8 + $0x28] sm:$0xff]  ;;  %s274_s5 = sshll.u32 %s271_s3, 4  ;;  %s275_s5 = int_to_ptr.hbm [resolvable:$true] %s274_s5 }
  0x42   : > { %220 = vst [vmem:[%s736_s17 + $0x30] sm:$0xff] %v212_v2  ;;  %v232_v14 = vld [vmem:[%s729_s8 + $0x30] sm:$0xff]  ;;  %v233_v15 = vld [vmem:[%s729_s8 + $0x38] sm:$0xff]  ;;  %v234_v16 = vld [vmem:[%s729_s8 + $0x40] sm:$0xff]  ;;  %s525_s25 = sshra.s32 %s275_s5, 4  ;;  %s526_s25 = int_to_ptr.hbm [resolvable:$true] %s525_s25 }
  0x43   : > { %221 = vst [vmem:[%s736_s17 + $0x48] sm:$0xff] %v213_v3  ;;  %v235_v17 = vld [vmem:[%s729_s8 + $0x48] sm:$0xff]  ;;  %v236_v18 = vld [vmem:[%s729_s8 + $0x50] sm:$0xff]  ;;  %v237_v19 = vld [vmem:[%s729_s8 + $0x58] sm:$0xff]  ;;  %s527_s28 = scalar_lea.hbm %s526_s25, 192  ;;  %p532_p9 = scmp.lt.s32.totalorder %s526_s25, %s813_s2 }
  0x44   : > { %222 = vst [vmem:[%s736_s17 + $0x60] sm:$0xff] %v214_v4  ;;  %v238_v20 = vld [vmem:[%s729_s8 + $0x60] sm:$0xff]  ;;  %v239_v21 = vld [vmem:[%s729_s8 + $0x68] sm:$0xff]  ;;  %v240_v22 = vld [vmem:[%s729_s8 + $0x70] sm:$0xff]  ;;  %p528_p6 = scmp.ne.s32.totalorder %s526_s25, %s527_s28  ;;  %p533_p1 = scmp.lt.s32.totalorder %s531_s6, %s527_s28 }
  0x45   : > { %223 = vst [vmem:[%s736_s17 + $0x78] sm:$0xff] %v215_v5  ;;  %v241_v23 = vld [vmem:[%s729_s8 + $0x78] sm:$0xff] }
  0x46   : > { %224 = vst [vmem:[%s736_s17 + $0x90] sm:$0xff] %v216_v6  ;;  %p529_p12 = pnand %p528_p6, %p653_p10  ;;  %p534_p3 = por %p533_p1, %p532_p9 }
  0x47   : > { %225 = vst [vmem:[%s736_s17 + $0xa8] sm:$0xff] %v217_v7 }
  0x48   : > { %242 = vst [vmem:[%s736_s17 + $0x8] sm:$0xff] %v226_v8  ;;  %p530_p2 = pneg %p529_p12 }
  0x49   : > { %243 = vst [vmem:[%s736_s17 + $0x10] sm:$0xff] %v227_v9 }
  0x4a   : > { %244 = vst [vmem:[%s736_s17 + $0x20] sm:$0xff] %v228_v10  ;;  %p535_p13 = pnand %p534_p3, %p530_p2 }
  0x4b   : > { %245 = vst [vmem:[%s736_s17 + $0x28] sm:$0xff] %v229_v11 }
  0x4c   : > { %246 = vst [vmem:[%s736_s17 + $0x38] sm:$0xff] %v230_v12 }
  0x4d   : > { %247 = vst [vmem:[%s736_s17 + $0x40] sm:$0xff] %v231_v13 }
  0x4e   : > { %248 = vst [vmem:[%s736_s17 + $0x50] sm:$0xff] %v232_v14 }
  0x4f   : > { %249 = vst [vmem:[%s736_s17 + $0x58] sm:$0xff] %v233_v15 }
  0x50   : > { %250 = vst [vmem:[%s736_s17 + $0x68] sm:$0xff] %v234_v16 }
  0x51   : > { %251 = vst [vmem:[%s736_s17 + $0x70] sm:$0xff] %v235_v17 }
  0x52   : > { %252 = vst [vmem:[%s736_s17 + $0x80] sm:$0xff] %v236_v18 }
  0x53   : > { %253 = vst [vmem:[%s736_s17 + $0x88] sm:$0xff] %v237_v19 }
  0x54   : > { %254 = vst [vmem:[%s736_s17 + $0x98] sm:$0xff] %v238_v20 }
  0x55   : > { %255 = vst [vmem:[%s736_s17 + $0xa0] sm:$0xff] %v239_v21 }
  0x56   : > { %256 = vst [vmem:[%s736_s17 + $0xb0] sm:$0xff] %v240_v22 }
  0x57   : > { %257 = vst [vmem:[%s736_s17 + $0xb8] sm:$0xff] %v241_v23 }
  0x58   : > { %538 = shalt.err (!%p535_p13)
}
  0x59   : > { %s587_s30 = smov 384   ;;  %s588_s4 = smov 24  }
  0x5a   : > { %398 = dma.vmem_to_hbm [thread:$0]  (%p653_p10), %s273_s13, 3072, %s275_s5, %s259_s24, %s587_s30, %s587_s30, %s588_s4  }
  0x5b PF: > { %p412_p0 = scmp.ge.s32.totalorder %s581_s12, 2  ;;  %s289_s26 = sand.u32 1, %s569_s9  }
  0x5c   : > { %s290_s8 = scalar_lea.sflag [#allocation4], %s289_s26 }
  0x5d   : > { %p408_p4 = pnand %p412_p0, %p657_p11 }
  0x5f   : > { %p409_p5 = pneg %p408_p4 }
  0x61   : > { %564 = dma.done.wait (%p409_p5), %s290_s8, 3072  }
  0x62   : > { %566 = vsyncadd (%p409_p5), %s290_s8, 4294964224  ;;  %p18_p7 = scmp.ge.s32.totalorder %s629_s15, 6   ;;  %s820_s9 = smov %s573_s10 }
  0x63   : > { %s821_s10 = smov %s577_s11  ;;  %s822_s11 = smov %s641_s18 }
  0x64   : > { %s823_s12 = smov %s629_s15  ;;  %20 = sbr.rel (!%p18_p7) target bundleno = 7 (0x7), region = 86 }
  0x69   :  { %296 = vsyncpa [#allocation3], 1 }
  0x6a   :  { %298 = vsyncpa [#allocation3 + $0x1], 1 }
  0x6b   :  { %299 = vsyncpa [#allocation6], 1 }
  0x6c   :  { %301 = vsyncpa [#allocation6 + $0x1], 1 }
  0x6d   :  { %302 = vsyncpa [#allocation4], 1 }
  0x6e   :  { %304 = vsyncpa [#allocation4 + $0x1], 1 }

</bundles_post_ra>
